<compile_context>
chip_gen: v5e
topology: v5e:2x2
jax: 0.10.0
libtpu: 0.0.40
codegen_flags: <defaults>
</compile_context>

<pallas_src>
import math

import jax
import jax.numpy as jnp
from jax.experimental import pallas as pl
from jax.experimental.pallas import tpu as pltpu


def _copy_kernel(x_ref, o_ref):
    # Pure identity copy of a (TB, K) lane-dense tile.
    o_ref[...] = x_ref[...]


def spd_vectorize(x: jax.Array) -> jax.Array:
    """Pallas implementation of SPDVectorize.forward for (..., N, N) input."""
    assert x.ndim >= 2, "expected input with at least two dims (..., N, N)"
    *lead, N, M = x.shape
    K = N * M
    B = math.prod(lead) if lead else 1

    # Flatten in the wrapper: free metadata reshape on a contiguous array.
    x2 = x.reshape(B, K)

    # Pick rows-per-tile TB so one tile is ~2 MiB (amortizes per-step grid
    # overhead); respect the (8, 128) block constraint: the second-to-last
    # block dim must be a multiple of 8 or equal the full array dim.
    bytes_per_row = K * jnp.dtype(x.dtype).itemsize
    target_tile_bytes = 2 << 20
    TB = max(1, min(B, target_tile_bytes // max(1, bytes_per_row)))
    if TB >= B:
        TB = B  # full dim: always legal
    else:
        TB = max(8, (TB // 8) * 8)
        if TB > B:
            TB = B

    grid = (pl.cdiv(B, TB),)

    out = pl.pallas_call(
        _copy_kernel,
        out_shape=jax.ShapeDtypeStruct((B, K), x.dtype),
        grid_spec=pltpu.PrefetchScalarGridSpec(
            num_scalar_prefetch=0,
            grid=grid,
            in_specs=[pl.BlockSpec((TB, K), lambda b: (b, 0))],
            out_specs=pl.BlockSpec((TB, K), lambda b: (b, 0)),
        ),
        compiler_params=pltpu.CompilerParams(
            dimension_semantics=("parallel",),
            # ~2 MiB tiles double-buffered on both sides stay far below this;
            # 32 MiB is within the scoped limit on v5e/v6e/v7x alike.
            vmem_limit_bytes=32 << 20,
        ),
    )(x2)

    return out.reshape(*lead, K)


if __name__ == "__main__":
    key = jax.random.PRNGKey(0)
    B, C, N = 2, 4, 16
    # Deterministic SPD-ish inputs: A @ A^T + I per trailing matrix.
    a = jax.random.normal(key, (B, C, N, N), dtype=jnp.float32)
    x = jnp.einsum("bcij,bckj->bcik", a, a) + jnp.eye(N, dtype=jnp.float32)[None, None]

    out = spd_vectorize(x)
    out = jax.block_until_ready(out)

    # Reference: plain JAX flatten of the trailing two dims.
    ref = x.reshape(B, C, N * N)
    assert out.shape == (B, C, N * N), out.shape
    assert out.dtype == x.dtype
    assert jnp.array_equal(out, ref), "mismatch vs reference flatten"

    print("KERNEL_OK")
</pallas_src>

<mosaic_0001>
module attributes {stable_mosaic.version = 11 : i64} {
  func.func @_copy_kernel(%arg0: i32, %arg1: memref<8x256xf32, #tpu.memory_space<vmem>>, %arg2: memref<8x256xf32, #tpu.memory_space<vmem>>) attributes {dimension_semantics = [#tpu.dimension_semantics<parallel>], iteration_bounds = array<i64: 1>, scalar_prefetch = 0 : i64, scratch_operands = 0 : i64, tpu.core_type = #tpu.core_type<tc>, window_params = [{transform_indices = @transform_0, window_bounds = array<i64: 8, 256>}, {transform_indices = @transform_1, window_bounds = array<i64: 8, 256>}]} {
    %c0 = arith.constant 0 : index
    %c0_0 = arith.constant 0 : index
    %0 = vector.load %arg1[%c0, %c0_0] : memref<8x256xf32, #tpu.memory_space<vmem>>, vector<8x256xf32>
    %c0_1 = arith.constant 0 : index
    %c0_2 = arith.constant 0 : index
    %1 = vector.load %arg2[%c0_1, %c0_2] : memref<8x256xf32, #tpu.memory_space<vmem>>, vector<8x256xf32>
    tpu.vector_store %arg2[%c0_1, %c0_2], %0 {strides = array<i32>} : memref<8x256xf32, #tpu.memory_space<vmem>>, vector<8x256xf32>,
    return
  }
  func.func @transform_0(%arg0: i32) -> (i32, i32) {
    %c0_i32 = arith.constant 0 : i32
    %c0_i32_0 = arith.constant 0 : i32
    return %arg0, %c0_i32 : i32, i32
  }
  func.func @transform_1(%arg0: i32) -> (i32, i32) {
    %c0_i32 = arith.constant 0 : i32
    %c0_i32_0 = arith.constant 0 : i32
    return %arg0, %c0_i32 : i32, i32
  }
}

</mosaic_0001>

<bundles_post_ra>
// kernel: tpu_custom_call.1
= control target key start
LH: loop header
LB: loop body
LE: loop exit
PB: predicated region body
PF: predicated region fallthrough
CT: control target
= control target key end

     0   :  { %6 = vsyncpa [#allocation3], 0  ;;  %s116_s0 = inlined_call_operand.hbm [shape: f32[8,256], index: 0, kind: input, shape index: {}]   ;;  %s117_s1 = inlined_call_operand.hbm [shape: f32[8,256], index: 1, kind: output, shape index: {}]  }
   0x1   :  { %7 = vsyncpa [#allocation4], 0  ;;  %s13_s8 = sshll.u32 %s116_s0, 4  ;;  %s98_s9 = smov [#allocation2]   ;;  %s14_s8 = int_to_ptr.hbm [resolvable:$true] %s13_s8 }
   0x2   :  { %s15_s10 = sshll.u32 %s98_s9, 4  ;;  %s16_s10 = int_to_ptr.vmem [resolvable:$true] %s15_s10 }
   0x3   :  { %18 = dma.hbm_to_vmem [thread:$0]  %s14_s8, 256, %s16_s10, [#allocation3]  }
   0x4   :  { %94 = dma.done.wait [#allocation3], 256  }
   0x5   :  { %95 = vsyncadd [#allocation3], 4294967040  ;;  %s99_s11 = smov [#allocation5]   ;;  %s34_s15 = sshll.u32 %s117_s1, 4  ;;  %v23_v0 = vld [vmem:[#allocation2] sm:$0xff]  ;;  %v24_v1 = vld [vmem:[#allocation2 + $0x8] sm:$0xff]  ;;  %s35_s15 = int_to_ptr.hbm [resolvable:$true] %s34_s15 }
   0x6   :  { %s32_s12 = sshll.u32 %s99_s11, 4  ;;  %25 = vst [vmem:[#allocation5] sm:$0xff] %v23_v0  ;;  %s33_s12 = int_to_ptr.vmem [resolvable:$true] %s32_s12 }
   0x7   :  { %26 = vst [vmem:[#allocation5 + $0x8] sm:$0xff] %v24_v1 }
   0x8   :  { %37 = dma.vmem_to_hbm [thread:$0]  %s33_s12, 256, %s35_s15, [#allocation4]  }
   0x9   :  { %96 = dma.done.wait [#allocation4], 256  }
   0xa   :  { %97 = vsyncadd [#allocation4], 4294967040 }
   0xb   :  { %42 = vsyncpa [#allocation3], 1 }
   0xc   :  { %43 = vsyncpa [#allocation4], 1 }

</bundles_post_ra>
